<compile_context>
chip_gen: v6e
topology: v6e:2x2x1
jax: 0.10.0
libtpu: 0.0.40
codegen_flags: <defaults>
</compile_context>

<pallas_src>
import functools

import jax
import jax.numpy as jnp
import numpy as np
from jax.experimental import pallas as pl
from jax.experimental.pallas import tpu as pltpu


# ----------------------------- Pallas kernel --------------------------------

def _make_mlp_kernel(n_act_layers: int):
    """Kernel computing:
         h = SiLU(x @ W1 + b1); h = SiLU(h @ Wi + bi) * n_inner; out = h @ Wo + bo
       Hidden stack runs only at vocab-tile j == 0 and is cached in VMEM scratch;
       every (i, j) step does one (tm, H) x (H, tn) matmul for its vocab slice.
    """

    def kernel(x_ref, *refs):
        # refs = (W1, b1, [Wi, bi]*, Wo_tile, bo_tile, out_ref, h_scratch)
        h_ref = refs[-1]
        o_ref = refs[-2]
        w_refs = refs[:-2]
        j = pl.program_id(1)

        @pl.when(j == 0)
        def _():
            h = x_ref[...]  # bf16 (tm, IN_pad)
            for li in range(n_act_layers):
                w = w_refs[2 * li][...]          # bf16
                b = w_refs[2 * li + 1][...]      # f32
                z = jnp.dot(h, w, preferred_element_type=jnp.float32) + b
                z = z * jax.nn.sigmoid(z)        # SiLU in f32
                h = z.astype(jnp.bfloat16)
            h_ref[...] = h

        wo = w_refs[-2][...]                     # bf16 (H_pad, tn)
        bo = w_refs[-1][...]                     # f32  (1, tn)
        o_ref[...] = (jnp.dot(h_ref[...], wo, preferred_element_type=jnp.float32)
                      + bo).astype(o_ref.dtype)

    return kernel


def _round_up(x: int, m: int) -> int:
    return pl.cdiv(x, m) * m


def _pad_to(arr, target_shape):
    pads = [(0, t - s) for s, t in zip(arr.shape, target_shape)]
    if all(p == (0, 0) for p in pads):
        return arr
    return jnp.pad(arr, pads)


def kgram_mlp_pallas(x, weights, biases, *, vocab_size, tm=256, tn=512):
    """x: (N, input_size) f32. weights[i]: (fan_in, fan_out), biases[i]: (1, fan_out).
    Returns logits (N, vocab_size) f32."""
    n_rows, in_dim = x.shape
    hidden = weights[0].shape[1]
    n_act_layers = len(weights) - 1  # layers followed by SiLU

    # Lane/sublane-friendly padded dims & effective tiles.
    in_pad = _round_up(in_dim, 128)
    h_pad = _round_up(hidden, 128)
    tn_eff = min(tn, _round_up(vocab_size, 128))
    v_pad = _round_up(vocab_size, tn_eff)
    tm_eff = min(tm, _round_up(n_rows, 16))          # bf16 sublane packing: mult of 16
    n_pad = _round_up(n_rows, tm_eff)

    # Pad + cast inputs/weights to bf16 (biases stay f32; zero padding is exact).
    x_p = _pad_to(x, (n_pad, in_pad)).astype(jnp.bfloat16)

    params = []
    in_specs = [pl.BlockSpec((tm_eff, in_pad), lambda i, j: (i, 0))]

    # Hidden layers (full weights resident per grid step).
    w0 = _pad_to(weights[0], (in_pad, h_pad)).astype(jnp.bfloat16)
    b0 = _pad_to(biases[0], (1, h_pad)).astype(jnp.float32)
    params += [w0, b0]
    in_specs += [pl.BlockSpec((in_pad, h_pad), lambda i, j: (0, 0)),
                 pl.BlockSpec((1, h_pad), lambda i, j: (0, 0))]
    for li in range(1, n_act_layers):
        wi = _pad_to(weights[li], (h_pad, h_pad)).astype(jnp.bfloat16)
        bi = _pad_to(biases[li], (1, h_pad)).astype(jnp.float32)
        params += [wi, bi]
        in_specs += [pl.BlockSpec((h_pad, h_pad), lambda i, j: (0, 0)),
                     pl.BlockSpec((1, h_pad), lambda i, j: (0, 0))]

    # Output projection, tiled over vocab columns.
    wo = _pad_to(weights[-1], (h_pad, v_pad)).astype(jnp.bfloat16)
    bo = _pad_to(biases[-1], (1, v_pad)).astype(jnp.float32)
    params += [wo, bo]
    in_specs += [pl.BlockSpec((h_pad, tn_eff), lambda i, j: (0, j)),
                 pl.BlockSpec((1, tn_eff), lambda i, j: (0, j))]

    grid = (n_pad // tm_eff, v_pad // tn_eff)

    out = pl.pallas_call(
        _make_mlp_kernel(n_act_layers),
        out_shape=jax.ShapeDtypeStruct((n_pad, v_pad), jnp.float32),
        grid_spec=pltpu.PrefetchScalarGridSpec(
            num_scalar_prefetch=0,
            grid=grid,
            in_specs=in_specs,
            out_specs=pl.BlockSpec((tm_eff, tn_eff), lambda i, j: (i, j)),
            scratch_shapes=[pltpu.VMEM((tm_eff, h_pad), jnp.bfloat16)],
        ),
        compiler_params=pltpu.CompilerParams(
            dimension_semantics=("parallel", "arbitrary"),
            vmem_limit_bytes=48 * 1024 * 1024,
        ),
    )(x_p, *params)

    return out[:n_rows, :vocab_size]


# ------------------------------ Model wrapper --------------------------------

def make_params(key, vocab_size, k, embed_size, num_inner_layers):
    """Deterministic synthetic parameters (shapes match the PyTorch __init__)."""
    d = embed_size // k
    input_size = d * k
    keys = jax.random.split(key, 2 + 2 * (2 + num_inner_layers))
    ki = iter(keys)

    embedding = jax.random.normal(next(ki), (vocab_size, d), jnp.float32) * 0.02

    dims = [input_size, embed_size] + [embed_size] * num_inner_layers + [vocab_size]
    weights, biases = [], []
    for i in range(len(dims) - 1):
        fan_in, fan_out = dims[i], dims[i + 1]
        w = jax.random.normal(next(ki), (fan_in, fan_out), jnp.float32) * 0.02
        b = jax.random.normal(next(ki), (1, fan_out), jnp.float32) * 0.01
        weights.append(w)
        biases.append(b)
    return embedding, weights, biases


def build_kgram_inputs(tokens_seq, embedding, k):
    """tokens_seq (seq_len, batch) int32 -> X (seq_len*batch, k*emb_dim) f32."""
    seq_len, batch = tokens_seq.shape
    d = embedding.shape[1]
    # Left-pad with token id 0 (PyTorch code pads context ids with 0).
    padded = jnp.concatenate(
        [jnp.zeros((k, batch), tokens_seq.dtype), tokens_seq], axis=0)
    # context for position t is padded[t : t + k]  (== original tokens t-k .. t-1)
    ctx = jnp.stack([padded[j:j + seq_len] for j in range(k)], axis=-1)  # (S,B,k)
    emb = embedding[ctx]                                                 # (S,B,k,d)
    x = emb.reshape(seq_len * batch, k * d)                              # row-major
    return x


@functools.partial(jax.jit,
                   static_argnames=("k", "num_inner_layers", "vocab_size", "tm", "tn"))
def kgram_mlp_seq_model(tokens_seq, embedding, weights, biases, *,
                        k, num_inner_layers, vocab_size, tm=256, tn=512):
    seq_len, batch = tokens_seq.shape
    x = build_kgram_inputs(tokens_seq, embedding, k)
    logits = kgram_mlp_pallas(x, list(weights), list(biases),
                              vocab_size=vocab_size, tm=tm, tn=tn)
    return logits.reshape(seq_len, batch, vocab_size)


def reference_forward(tokens_seq, embedding, weights, biases, *, k, vocab_size):
    """Pure-JAX f32 reference mirroring the PyTorch forward."""
    seq_len, batch = tokens_seq.shape
    h = build_kgram_inputs(tokens_seq, embedding, k)
    for i, (w, b) in enumerate(zip(weights, biases)):
        h = h @ w + b
        if i < len(weights) - 1:
            h = h * jax.nn.sigmoid(h)  # SiLU
    return h.reshape(seq_len, batch, vocab_size)


# ---------------------------------- Main -------------------------------------

if __name__ == "__main__":
    vocab_size = 384
    k = 3
    embed_size = 96            # embed_size // k = 32, input_size = 96 (padded to 128)
    num_inner_layers = 1
    seq_len, batch = 24, 12    # N = 288 rows -> padded to 384 with tm=128

    key = jax.random.PRNGKey(0)
    pkey, tkey = jax.random.split(key)
    embedding, weights, biases = make_params(
        pkey, vocab_size, k, embed_size, num_inner_layers)

    tokens_seq = jax.random.randint(
        tkey, (seq_len, batch), 0, vocab_size, dtype=jnp.int32)

    # Small tiles here purely to exercise the (row, vocab) grid at test size;
    # production default is tm=256, tn=512.
    out = kgram_mlp_seq_model(
        tokens_seq, embedding, tuple(weights), tuple(biases),
        k=k, num_inner_layers=num_inner_layers, vocab_size=vocab_size,
        tm=128, tn=128)
    out = jax.block_until_ready(out)

    assert out.shape == (seq_len, batch, vocab_size)
    ref = reference_forward(tokens_seq, embedding, weights, biases,
                            k=k, vocab_size=vocab_size)
    # bf16 matmul inputs with f32 accumulation -> loose-ish tolerance.
    np.testing.assert_allclose(np.asarray(out), np.asarray(ref),
                               rtol=2e-2, atol=2e-3)

    print("KERNEL_OK")
</pallas_src>

<mosaic_0001>
module attributes {stable_mosaic.version = 11 : i64} {
  func.func @kernel(%arg0: i32, %arg1: i32, %arg2: memref<128x128xbf16, #tpu.memory_space<vmem>>, %arg3: memref<128x128xbf16, #tpu.memory_space<vmem>>, %arg4: memref<1x128xf32, #tpu.memory_space<vmem>>, %arg5: memref<128x128xbf16, #tpu.memory_space<vmem>>, %arg6: memref<1x128xf32, #tpu.memory_space<vmem>>, %arg7: memref<128x128xbf16, #tpu.memory_space<vmem>>, %arg8: memref<1x128xf32, #tpu.memory_space<vmem>>, %arg9: memref<128x128xf32, #tpu.memory_space<vmem>>, %arg10: memref<128x128xbf16, #tpu.memory_space<vmem>>) attributes {dimension_semantics = [#tpu.dimension_semantics<parallel>, #tpu.dimension_semantics<arbitrary>], iteration_bounds = array<i64: 3, 3>, scalar_prefetch = 0 : i64, scratch_operands = 1 : i64, tpu.core_type = #tpu.core_type<tc>, window_params = [{transform_indices = @transform_0, window_bounds = array<i64: 128, 128>}, {pipeline_mode = #tpu.pipeline_mode<synchronous>, transform_indices = @transform_1, window_bounds = array<i64: 128, 128>}, {pipeline_mode = #tpu.pipeline_mode<synchronous>, transform_indices = @transform_2, window_bounds = array<i64: 1, 128>}, {pipeline_mode = #tpu.pipeline_mode<synchronous>, transform_indices = @transform_3, window_bounds = array<i64: 128, 128>}, {pipeline_mode = #tpu.pipeline_mode<synchronous>, transform_indices = @transform_4, window_bounds = array<i64: 1, 128>}, {transform_indices = @transform_5, window_bounds = array<i64: 128, 128>}, {transform_indices = @transform_6, window_bounds = array<i64: 1, 128>}, {transform_indices = @transform_7, window_bounds = array<i64: 128, 128>}]} {
    %c0_i32 = arith.constant 0 : i32
    %0 = arith.cmpi eq, %arg1, %c0_i32 : i32
    %1 = arith.extui %0 : i1 to i32
    %c0_i32_0 = arith.constant 0 : i32
    %2 = arith.cmpi ne, %1, %c0_i32_0 : i32
    scf.if %2 {
      %c0_8 = arith.constant 0 : index
      %c0_9 = arith.constant 0 : index
      %10 = vector.load %arg2[%c0_8, %c0_9] : memref<128x128xbf16, #tpu.memory_space<vmem>>, vector<128x128xbf16>
      %c0_10 = arith.constant 0 : index
      %c0_11 = arith.constant 0 : index
      %11 = vector.load %arg3[%c0_10, %c0_11] : memref<128x128xbf16, #tpu.memory_space<vmem>>, vector<128x128xbf16>
      %c0_12 = arith.constant 0 : index
      %c0_13 = arith.constant 0 : index
      %12 = vector.load %arg4[%c0_12, %c0_13] : memref<1x128xf32, #tpu.memory_space<vmem>>, vector<1x128xf32>
      %cst_14 = arith.constant dense<0.000000e+00> : vector<128x128xf32>
      %13 = tpu.matmul %10, %11, %cst_14 {dimension_numbers = #tpu.dot_dimension_numbers<[1], [0], [0], [1], [0, 0, 1, 1], [], []>} : vector<128x128xbf16>, vector<128x128xbf16>, vector<128x128xf32> -> vector<128x128xf32>
      %14 = vector.broadcast %12 : vector<1x128xf32> to vector<128x128xf32>
      %15 = arith.addf %13, %14 : vector<128x128xf32>
      %16 = arith.negf %15 : vector<128x128xf32>
      %17 = math.exp %16 : vector<128x128xf32>
      %cst_15 = arith.constant 1.000000e+00 : f32
      %18 = vector.broadcast %cst_15 : f32 to vector<128x128xf32>
      %19 = arith.addf %18, %17 : vector<128x128xf32>
      %20 = arith.divf %18, %19 : vector<128x128xf32>
      %21 = arith.mulf %15, %20 : vector<128x128xf32>
      %22 = arith.truncf %21 : vector<128x128xf32> to vector<128x128xbf16>
      %c0_16 = arith.constant 0 : index
      %c0_17 = arith.constant 0 : index
      %23 = vector.load %arg5[%c0_16, %c0_17] : memref<128x128xbf16, #tpu.memory_space<vmem>>, vector<128x128xbf16>
      %c0_18 = arith.constant 0 : index
      %c0_19 = arith.constant 0 : index
      %24 = vector.load %arg6[%c0_18, %c0_19] : memref<1x128xf32, #tpu.memory_space<vmem>>, vector<1x128xf32>
      %cst_20 = arith.constant dense<0.000000e+00> : vector<128x128xf32>
      %25 = tpu.matmul %22, %23, %cst_20 {dimension_numbers = #tpu.dot_dimension_numbers<[1], [0], [0], [1], [0, 0, 1, 1], [], []>} : vector<128x128xbf16>, vector<128x128xbf16>, vector<128x128xf32> -> vector<128x128xf32>
      %26 = vector.broadcast %24 : vector<1x128xf32> to vector<128x128xf32>
      %27 = arith.addf %25, %26 : vector<128x128xf32>
      %28 = arith.negf %27 : vector<128x128xf32>
      %29 = math.exp %28 : vector<128x128xf32>
      %cst_21 = arith.constant 1.000000e+00 : f32
      %30 = vector.broadcast %cst_21 : f32 to vector<128x128xf32>
      %31 = arith.addf %30, %29 : vector<128x128xf32>
      %32 = arith.divf %30, %31 : vector<128x128xf32>
      %33 = arith.mulf %27, %32 : vector<128x128xf32>
      %34 = arith.truncf %33 : vector<128x128xf32> to vector<128x128xbf16>
      %c0_22 = arith.constant 0 : index
      %c0_23 = arith.constant 0 : index
      %35 = vector.load %arg10[%c0_22, %c0_23] : memref<128x128xbf16, #tpu.memory_space<vmem>>, vector<128x128xbf16>
      tpu.vector_store %arg10[%c0_22, %c0_23], %34 {strides = array<i32>} : memref<128x128xbf16, #tpu.memory_space<vmem>>, vector<128x128xbf16>,
    } else {
    }
    %c0 = arith.constant 0 : index
    %c0_1 = arith.constant 0 : index
    %3 = vector.load %arg7[%c0, %c0_1] : memref<128x128xbf16, #tpu.memory_space<vmem>>, vector<128x128xbf16>
    %c0_2 = arith.constant 0 : index
    %c0_3 = arith.constant 0 : index
    %4 = vector.load %arg8[%c0_2, %c0_3] : memref<1x128xf32, #tpu.memory_space<vmem>>, vector<1x128xf32>
    %c0_4 = arith.constant 0 : index
    %c0_5 = arith.constant 0 : index
    %5 = vector.load %arg10[%c0_4, %c0_5] : memref<128x128xbf16, #tpu.memory_space<vmem>>, vector<128x128xbf16>
    %cst = arith.constant dense<0.000000e+00> : vector<128x128xf32>
    %6 = tpu.matmul %5, %3, %cst {dimension_numbers = #tpu.dot_dimension_numbers<[1], [0], [0], [1], [0, 0, 1, 1], [], []>} : vector<128x128xbf16>, vector<128x128xbf16>, vector<128x128xf32> -> vector<128x128xf32>
    %7 = vector.broadcast %4 : vector<1x128xf32> to vector<128x128xf32>
    %8 = arith.addf %6, %7 : vector<128x128xf32>
    %c0_6 = arith.constant 0 : index
    %c0_7 = arith.constant 0 : index
    %9 = vector.load %arg9[%c0_6, %c0_7] : memref<128x128xf32, #tpu.memory_space<vmem>>, vector<128x128xf32>
    tpu.vector_store %arg9[%c0_6, %c0_7], %8 {strides = array<i32>} : memref<128x128xf32, #tpu.memory_space<vmem>>, vector<128x128xf32>,
    return
  }
  func.func @transform_0(%arg0: i32, %arg1: i32) -> (i32, i32) {
    %c0_i32 = arith.constant 0 : i32
    %c0_i32_0 = arith.constant 0 : i32
    return %arg0, %c0_i32 : i32, i32
  }
  func.func @transform_1(%arg0: i32, %arg1: i32) -> (i32, i32) {
    %c0_i32 = arith.constant 0 : i32
    %c0_i32_0 = arith.constant 0 : i32
    %c0_i32_1 = arith.constant 0 : i32
    return %c0_i32, %c0_i32_0 : i32, i32
  }
  func.func @transform_2(%arg0: i32, %arg1: i32) -> (i32, i32) {
    %c0_i32 = arith.constant 0 : i32
    %c0_i32_0 = arith.constant 0 : i32
    %c0_i32_1 = arith.constant 0 : i32
    return %c0_i32, %c0_i32_0 : i32, i32
  }
  func.func @transform_3(%arg0: i32, %arg1: i32) -> (i32, i32) {
    %c0_i32 = arith.constant 0 : i32
    %c0_i32_0 = arith.constant 0 : i32
    %c0_i32_1 = arith.constant 0 : i32
    return %c0_i32, %c0_i32_0 : i32, i32
  }
  func.func @transform_4(%arg0: i32, %arg1: i32) -> (i32, i32) {
    %c0_i32 = arith.constant 0 : i32
    %c0_i32_0 = arith.constant 0 : i32
    %c0_i32_1 = arith.constant 0 : i32
    return %c0_i32, %c0_i32_0 : i32, i32
  }
  func.func @transform_5(%arg0: i32, %arg1: i32) -> (i32, i32) {
    %c0_i32 = arith.constant 0 : i32
    %c0_i32_0 = arith.constant 0 : i32
    return %c0_i32, %arg1 : i32, i32
  }
  func.func @transform_6(%arg0: i32, %arg1: i32) -> (i32, i32) {
    %c0_i32 = arith.constant 0 : i32
    %c0_i32_0 = arith.constant 0 : i32
    return %c0_i32, %arg1 : i32, i32
  }
  func.func @transform_7(%arg0: i32, %arg1: i32) -> (i32, i32) {
    %c0_i32 = arith.constant 0 : i32
    return %arg0, %arg1 : i32, i32
  }
}

</mosaic_0001>

<bundles_post_ra>
// kernel: kgram_mlp_seq_model.1
= control target key start
LH: loop header
LB: loop body
LE: loop exit
PB: predicated region body
PF: predicated region fallthrough
CT: control target
= control target key end

     0   :  { %s2699_s0 = inlined_call_operand.vmem [shape: bf16[384,128], index: 0, kind: input, shape index: {}]   ;;  %s2700_s1 = inlined_call_operand.vmem [shape: bf16[128,128], index: 1, kind: input, shape index: {}]   ;;  %s2701_s2 = inlined_call_operand.vmem [shape: f32[1,128], index: 2, kind: input, shape index: {}]   ;;  %s2702_s3 = inlined_call_operand.vmem [shape: bf16[128,128], index: 3, kind: input, shape index: {}]   ;;  %s2703_s4 = inlined_call_operand.vmem [shape: f32[1,128], index: 4, kind: input, shape index: {}]   ;;  %s2704_s5 = inlined_call_operand.vmem [shape: bf16[128,384], index: 5, kind: input, shape index: {}]   ;;  %s2705_s6 = inlined_call_operand.vmem [shape: f32[1,384], index: 6, kind: input, shape index: {}]   ;;  %s2706_s7 = inlined_call_operand.vmem [shape: f32[384,384], index: 7, kind: output, shape index: {}]  }
   0x1   :  { %2710 = sst [smem:[#allocation8_spill]] %s2704_s5 }
   0x2   :  { %s2273_s24 = smov 0   ;;  %s2275_s25 = smov 0  }
   0x3   :  { %s2277_s26 = smov 0   ;;  %s2279_s27 = smov 0  }
   0x4   :  { %s2281_s28 = smov 0   ;;  %s2283_s29 = smov 0  }
   0x5   :  { %s2285_s30 = smov 0   ;;  %s2287_s8 = smov 0  }
   0x6   :  { %s2289_s9 = smov 0  }
   0x7 LB: > { %2711 = sst [smem:[#allocation5_spill]] %s2227_s8  ;;  %s1588_s10 = sadd.s32 4294967295, %s2231_s9   ;;  %s2231_s9 = sphi %s2289_s9, %s17_s9   ;;  %s2227_s8 = sphi %s2287_s8, %s2718_s8   ;;  %s2223_s30 = sphi %s2285_s30, %s2724_s30   ;;  %s2219_s29 = sphi %s2283_s29, %s2716_s29   ;;  %s2215_s28 = sphi %s2281_s28, %s2723_s28   ;;  %s2211_s27 = sphi %s2279_s27, %s2722_s27   ;;  %s2207_s26 = sphi %s2277_s26, %s2721_s26   ;;  %s2203_s25 = sphi %s2275_s25, %s2720_s25   ;;  %s2199_s24 = sphi %s2273_s24, %s2719_s24  }
   0x8   : > { %s26_s11 = sadd.s32 1, %s2223_s30  ;;  %s29_s12 = sadd.s32 1, %s2227_s8 }
   0x9   : > { %p27_p0 = scmp.ge.s32.totalorder %s26_s11, 3  ;;  %s146_s13 = sadd.s32 1, %s2211_s27 }
   0xa   : > { %p153_p1 = scmp.ne.s32.totalorder %s2211_s27, %s2207_s26  ;;  %p154_p2 = scmp.eq.s32.totalorder %s2231_s9, 0 }
   0xb   : > { %s2726_s11 = smov (%p27_p0, %s26_s11), 0  ;;  %s2728_s12 = smov (!%p27_p0, %s29_s12), %s2227_s8 }
   0xc   : > { %2712 = sst [smem:[#allocation6_spill]] %s2726_s11  ;;  %s143_s14 = ssub.s32 %s2223_s30, %s2726_s11 }
   0xd   : > { %p31_p3 = scmp.ge.s32.totalorder %s2728_s12, 3  ;;  %p144_p4 = scmp.eq.s32.totalorder %s143_s14, 0 }
   0xe   : > { %p155_p5 = por %p154_p2, %p153_p1  ;;  %s200_s15 = sadd.s32 1, %s2203_s25 }
   0xf   : > { %s2730_s12 = smov (%p31_p3, %s2728_s12), 0  ;;  %p210_p6 = scmp.ne.s32.totalorder %s2203_s25, %s2199_s24 }
  0x10   : > { %2713 = sst [smem:[#allocation7_spill]] %s2730_s12  ;;  %s195_s17 = ssub.s32 %s2227_s8, %s2730_s12 }
  0x11   : > { %s2334_s16 = scalar_select %p144_p4, %s2211_s27, %s146_s13  }
  0x12   : > { %s197_s18 = sor.u32 %s195_s17, %s143_s14  ;;  %p211_p7 = scmp.eq.s32.totalorder %s1588_s10, 8 }
  0x13   : > { %p198_p8 = scmp.eq.s32.totalorder %s197_s18, 0  ;;  %p1591_p10 = scmp.ge.s32.totalorder %s2231_s9, 9 }
  0x14   : > { %p2340_p9 = por %p211_p7, %p210_p6 }
  0x15   : > { %s2345_s20 = scalar_select %p198_p8, %s2203_s25, %s200_s15  }
  0x16   : > { %245 = sbr.rel (%p1591_p10) target bundleno = 47 (0x2f), region = 32 }
  0x1b   : > { %257 = sbr.rel (!%p155_p5) target bundleno = 47 (0x2f), region = 40  ;;  %s259_s21 = sand.u32 (%p155_p5), 1, %s2211_s27  }
  0x1c   : > { %s1593_s22 = sshll.u32 (%p155_p5), %s2223_s30, 2  ;;  %s1592_s23 = sshll.u32 (%p155_p5), %s259_s21, 6 }
  0x1d   : > { %s2715_s5 = sld [smem:[#allocation8_spill]] (%p155_p5)  ;;  %s261_s14 = scalar_lea.vmem (%p155_p5), [#allocation3], %s1592_s23 }
  0x23   : > { %s2353_s10 = scalar_lea.vmem %s2715_s5, %s1593_s22 }
  0x24   : > { %v280_v0 = vld [vmem:[%s2353_s10] sm:$0xf]  ;;  %v282_v1 = vld [vmem:[%s2353_s10 + $0xc] sm:$0xf]  ;;  %v284_v2 = vld [vmem:[%s2353_s10 + $0x18] sm:$0xf] }
  0x25   : > { %281 = vst [vmem:[%s261_s14] sm:$0xf] %v280_v0  ;;  %283 = vst [vmem:[%s261_s14 + $0x4] sm:$0xf] %v282_v1  ;;  %v286_v3 = vld [vmem:[%s2353_s10 + $0x24] sm:$0xf] }
  0x26   : > { %v288_v4 = vld [vmem:[%s2353_s10 + $0x30] sm:$0xf]  ;;  %285 = vst [vmem:[%s261_s14 + $0x8] sm:$0xf] %v284_v2  ;;  %287 = vst [vmem:[%s261_s14 + $0xc] sm:$0xf] %v286_v3 }
  0x27   : > { %289 = vst [vmem:[%s261_s14 + $0x10] sm:$0xf] %v288_v4  ;;  %v290_v5 = vld [vmem:[%s2353_s10 + $0x3c] sm:$0xf]  ;;  %v292_v6 = vld [vmem:[%s2353_s10 + $0x48] sm:$0xf] }
  0x28   : > { %v294_v7 = vld [vmem:[%s2353_s10 + $0x54] sm:$0xf]  ;;  %291 = vst [vmem:[%s261_s14 + $0x14] sm:$0xf] %v290_v5  ;;  %293 = vst [vmem:[%s261_s14 + $0x18] sm:$0xf] %v292_v6 }
  0x29   : > { %295 = vst [vmem:[%s261_s14 + $0x1c] sm:$0xf] %v294_v7  ;;  %v296_v8 = vld [vmem:[%s2353_s10 + $0x60] sm:$0xf]  ;;  %v298_v9 = vld [vmem:[%s2353_s10 + $0x6c] sm:$0xf] }
  0x2a   : > { %v300_v10 = vld [vmem:[%s2353_s10 + $0x78] sm:$0xf]  ;;  %297 = vst [vmem:[%s261_s14 + $0x20] sm:$0xf] %v296_v8  ;;  %299 = vst [vmem:[%s261_s14 + $0x24] sm:$0xf] %v298_v9 }
  0x2b   : > { %301 = vst [vmem:[%s261_s14 + $0x28] sm:$0xf] %v300_v10  ;;  %v302_v11 = vld [vmem:[%s2353_s10 + $0x84] sm:$0xf]  ;;  %v304_v12 = vld [vmem:[%s2353_s10 + $0x90] sm:$0xf] }
  0x2c   : > { %v306_v13 = vld [vmem:[%s2353_s10 + $0x9c] sm:$0xf]  ;;  %303 = vst [vmem:[%s261_s14 + $0x2c] sm:$0xf] %v302_v11  ;;  %305 = vst [vmem:[%s261_s14 + $0x30] sm:$0xf] %v304_v12 }
  0x2d   : > { %307 = vst [vmem:[%s261_s14 + $0x34] sm:$0xf] %v306_v13  ;;  %v308_v14 = vld [vmem:[%s2353_s10 + $0xa8] sm:$0xf]  ;;  %v310_v15 = vld [vmem:[%s2353_s10 + $0xb4] sm:$0xf] }
  0x2e   : > { %309 = vst [vmem:[%s261_s14 + $0x38] sm:$0xf] %v308_v14  ;;  %311 = vst [vmem:[%s261_s14 + $0x3c] sm:$0xf] %v310_v15 }
  0x2f PF: > { %p1594_p11 = scmp.ge.s32.totalorder %s2231_s9, 1  ;;  %p372_p12 = scmp.lt.s32.totalorder %s2231_s9, 10 }
  0x31   : > { %p373_p13 = pnand %p1594_p11, %p372_p12 }
  0x32   : > { %s379_s12 = sand.u32 (!%p373_p13), 1, %s2207_s26   ;;  %s414_s15 = sand.u32 (!%p373_p13), 1, %s2199_s24  }
  0x33   : > { %376 = sbr.rel (%p373_p13) target bundleno = 848 (0x350), region = 85  ;;  %s1595_s17 = sshll.u32 (!%p373_p13), %s379_s12, 6 }
  0x34   : > { %s1596_s18 = sshll.u32 (!%p373_p13), %s414_s15, 7  ;;  %s1597_s21 = sshll.u32 (!%p373_p13), %s2219_s29, 4 }
  0x35   : > { %p423_p0 = scmp.lt.s32.totalorder (!%p373_p13), %s2215_s28, 2  ;;  %p418_p1 = scmp.lt.s32.totalorder (!%p373_p13), %s1597_s21, 47 }
  0x36   : > { %s2389_s24 = scalar_lea.vmem (!%p373_p13), [#allocation3], %s1595_s17  ;;  %s2391_s26 = scalar_lea.vmem (!%p373_p13), [#allocation4], %s1596_s18 }
  0x37   : > { %p1599_p2 = scmp.ne.s32.totalorder (!%p373_p13), %s2215_s28, 0 }
  0x38   : > { %s2378_s22 = scalar_select %p423_p0, %s2215_s28, 2 }
  0x39   : > { %s2732_s21 = smov (!%p418_p1, %s1597_s21), 47  ;;  %431 = sbr.rel (%p1599_p2) target bundleno = 596 (0x254), region = 93 }
  0x3a   : > { %s425_s10 = scalar_lea.vmem %s2705_s6, %s2378_s22  ;;  %s1598_s14 = sshll.u32 %s2732_s21, 2 }
  0x3b   : > { %s2387_s8 = scalar_lea.vmem %s2699_s0, %s1598_s14 }
  0x3e   : > { %v1993_v16 = vld [vmem:[%s2700_s1 + $0x38] sm:$0xff]   ;;  %v1994_v17 = vld [vmem:[%s2700_s1 + $0x30] sm:$0xff]   ;;  %v1995_v18 = vld [vmem:[%s2700_s1 + $0x28] sm:$0xff]  }
  0x3f   : > { %1808 = vmatprep.subr.bf16.mxu0 %v1993_v16  ;;  %v1996_v19 = vld [vmem:[%s2700_s1 + $0x20] sm:$0xff]   ;;  %v1997_v21 = vld [vmem:[%s2700_s1 + $0x18] sm:$0xff]   ;;  %v1998_v22 = vld [vmem:[%s2700_s1 + $0x10] sm:$0xff]  }
  0x40   : > { %1809 = vmatpush3.bf16.msra.mxu0 %v1993_v16  ;;  %v2001_v20 = vld [vmem:[%s2387_s8] sm:$0xff]   ;;  %v1999_v23 = vld [vmem:[%s2700_s1 + $0x8] sm:$0xff]   ;;  %v2003_v26 = vld [vmem:[%s2387_s8 + $0x10] sm:$0xff]  }
  0x41   : > { %1810 = vmatprep.subr.bf16.mxu0 %v1994_v17  ;;  %1824 = vmatprep.mubr.bf16.mxu0 %v2001_v20  ;;  %v2000_v24 = vld [vmem:[%s2700_s1] sm:$0xff]   ;;  %v2002_v25 = vld [vmem:[%s2387_s8 + $0x8] sm:$0xff]   ;;  %v2004_v27 = vld [vmem:[%s2387_s8 + $0x18] sm:$0xff]  }
  0x42   : > { %v2005_v28 = vld [vmem:[%s2387_s8 + $0x20] sm:$0xff]   ;;  %v2006_v29 = vld [vmem:[%s2387_s8 + $0x28] sm:$0xff]   ;;  %v2007_v30 = vld [vmem:[%s2387_s8 + $0x30] sm:$0xff]  }
  0x43   : > { %v2008_v31 = vld [vmem:[%s2387_s8 + $0x38] sm:$0xff]   ;;  %v2010_v33 = vld [vmem:[%s2702_s3 + $0x30] sm:$0xff]   ;;  %v2011_v34 = vld [vmem:[%s2702_s3 + $0x28] sm:$0xff]  }
  0x44   : > { %1811 = vmatpush3.bf16.msra.mxu0 %v1994_v17  ;;  %v2009_v32 = vld [vmem:[%s2702_s3 + $0x38] sm:$0xff]   ;;  %v2012_v35 = vld [vmem:[%s2702_s3 + $0x20] sm:$0xff]   ;;  %v2014_v37 = vld [vmem:[%s2702_s3 + $0x10] sm:$0xff]  }
  0x45   : > { %1812 = vmatprep.subr.bf16.mxu0 %v1995_v18  ;;  %1840 = vmatprep.subr.bf16.mxu1 %v2009_v32  ;;  %v2013_v36 = vld [vmem:[%s2702_s3 + $0x18] sm:$0xff]   ;;  %v2015_v38 = vld [vmem:[%s2702_s3 + $0x8] sm:$0xff]   ;;  %v2016_v39 = vld [vmem:[%s2702_s3] sm:$0xff]  }
  0x46   : > { %1841 = vmatpush3.bf16.msra.mxu1 %v2009_v32  ;;  %v2453_v40 = vld [vmem:[%s2701_s2] ss:$0 sm:$0xff] }
  0x47   : > { %1842 = vmatprep.subr.bf16.mxu1 %v2010_v33 }
  0x48   : > { %1813 = vmatpush3.bf16.msra.mxu0 %v1995_v18 }
  0x49   : > { %1814 = vmatprep.subr.bf16.mxu0 %v1996_v19 }
  0x4a   : > { %1843 = vmatpush3.bf16.msra.mxu1 %v2010_v33 }
  0x4b   : > { %1844 = vmatprep.subr.bf16.mxu1 %v2011_v34 }
  0x4c   : > { %1815 = vmatpush3.bf16.msra.mxu0 %v1996_v19 }
  0x4d   : > { %1816 = vmatprep.subr.bf16.mxu0 %v1997_v21 }
  0x4e   : > { %1845 = vmatpush3.bf16.msra.mxu1 %v2011_v34 }
  0x4f   : > { %1846 = vmatprep.subr.bf16.mxu1 %v2012_v35 }
  0x50   : > { %1817 = vmatpush3.bf16.msra.mxu0 %v1997_v21 }
  0x51   : > { %1818 = vmatprep.subr.bf16.mxu0 %v1998_v22 }
  0x52   : > { %1847 = vmatpush3.bf16.msra.mxu1 %v2012_v35 }
  0x53   : > { %1848 = vmatprep.subr.bf16.mxu1 %v2013_v36 }
  0x54   : > { %1819 = vmatpush3.bf16.msra.mxu0 %v1998_v22 }
  0x55   : > { %1820 = vmatprep.subr.bf16.mxu0 %v1999_v23 }
  0x56   : > { %1849 = vmatpush3.bf16.msra.mxu1 %v2013_v36 }
  0x57   : > { %1850 = vmatprep.subr.bf16.mxu1 %v2014_v37 }
  0x58   : > { %1821 = vmatpush3.bf16.msra.mxu0 %v1999_v23 }
  0x59   : > { %1822 = vmatprep.subr.bf16.mxu0 %v2000_v24 }
  0x5a   : > { %1851 = vmatpush3.bf16.msra.mxu1 %v2014_v37 }
  0x5b   : > { %1852 = vmatprep.subr.bf16.mxu1 %v2015_v38 }
  0x5c   : > { %1823 = vmatpush3.bf16.msra.mxu0 %v2000_v24 }
  0x5e   : > { %1853 = vmatpush3.bf16.msra.mxu1 %v2015_v38 }
  0x5f   : > { %1825 = vmatmul.mubr.bf16.vlgmr.msra.gmra.mxu0 %v2002_v25  ;;  %1854 = vmatprep.subr.bf16.mxu1 %v2016_v39 }
  0x60   : > { %1828 = vmatprep.mubr.bf16.mxu0 %v2003_v26 }
  0x62   : > { %1855 = vmatpush3.bf16.msra.mxu1 %v2016_v39 }
  0x67   : > { %1829 = vmatmul.mubr.bf16.gmra.mxu0 %v2004_v27 }
  0x68   : > { %1832 = vmatprep.mubr.bf16.mxu0 %v2005_v28 }
  0x6f   : > { %1833 = vmatmul.mubr.bf16.gmra.mxu0 %v2006_v29 }
  0x70   : > { %1836 = vmatprep.mubr.bf16.mxu0 %v2007_v30 }
  0x77   : > { %1837 = vmatmul.mubr.bf16.gmra.mxu0 %v2008_v31 }
 0x11f   : > { %v1826_v41 = vpop.f32.mrf.mxu0 }
 0x120   : > { %v2456_v42 = vadd.f32 %v1826_v41, %v2453_v40 }
 0x121   : > { %v601_v43 = vpop.f32.mrf.mxu0 }
 0x122   : > { %v1619_v44 = vmul.f32 -1.442695, %v2456_v42  ;;  %v2460_v45 = vadd.f32 %v2453_v40, %v601_v43 }
 0x123   : > { %v1827_v46 = vpop.f32.mrf.mxu0 }
 0x124   : > { %2017 = vpow2.f32 %v1619_v44  ;;  %v1617_v47 = vmul.f32 -1.442695, %v2460_v45  ;;  %v2464_v48 = vadd.f32 %v1827_v46, %v2453_v40 }
 0x125   : > { %v604_v49 = vpop.f32.mrf.mxu0 }
 0x126   : > { %2019 = vpow2.f32 %v1617_v47  ;;  %v1620_v50 = vmul.f32 -1.442695, %v2464_v48  ;;  %v2468_v51 = vadd.f32 %v2453_v40, %v604_v49 }
 0x127   : > { %v1830_v52 = vpop.f32.mrf.mxu0 }
 0x128   : > { %2021 = vpow2.f32 %v1620_v50  ;;  %v1618_v53 = vmul.f32 -1.442695, %v2468_v51  ;;  %v2472_v54 = vadd.f32 %v1830_v52, %v2453_v40 }
 0x129   : > { %v617_v55 = vpop.f32.mrf.mxu0 }
 0x12a   : > { %2023 = vpow2.f32 %v1618_v53  ;;  %v1623_v56 = vmul.f32 -1.442695, %v2472_v54  ;;  %v2476_v57 = vadd.f32 %v2453_v40, %v617_v55 }
 0x12b   : > { %v1831_v58 = vpop.f32.mrf.mxu0 }
 0x12c   : > { %2025 = vpow2.f32 %v1623_v56  ;;  %v1621_v59 = vmul.f32 -1.442695, %v2476_v57  ;;  %v2480_v60 = vadd.f32 %v1831_v58, %v2453_v40 }
 0x12d   : > { %v620_v61 = vpop.f32.mrf.mxu0 }
 0x12e   : > { %2027 = vpow2.f32 %v1621_v59  ;;  %v1624_v62 = vmul.f32 -1.442695, %v2480_v60  ;;  %v2484_v63 = vadd.f32 %v2453_v40, %v620_v61 }
 0x12f   : > { %v1834_v0 = vpop.f32.mrf.mxu0 }
 0x130   : > { %2029 = vpow2.f32 %v1624_v62  ;;  %v1622_v1 = vmul.f32 -1.442695, %v2484_v63  ;;  %v2488_v2 = vadd.f32 %v1834_v0, %v2453_v40 }
 0x131   : > { %v2018_v3 = vpop.eup %2017  ;;  %v633_v4 = vpop.f32.mrf.mxu0 }
 0x132   : > { %v714_v5 = vadd.f32 1.0, %v2018_v3  ;;  %2031 = vpow2.f32 %v1622_v1  ;;  %v1627_v6 = vmul.f32 -1.442695, %v2488_v2  ;;  %v2492_v7 = vadd.f32 %v2453_v40, %v633_v4 }
 0x133   : > { %v2020_v8 = vpop.eup %2019  ;;  %v1835_v9 = vpop.f32.mrf.mxu0 }
 0x134   : > { %2033 = vrcp.f32 %v714_v5  ;;  %v712_v10 = vadd.f32 1.0, %v2020_v8  ;;  %v1625_v11 = vmul.f32 -1.442695, %v2492_v7  ;;  %v2496_v12 = vadd.f32 %v1835_v9, %v2453_v40 }
 0x135   : > { %v2022_v13 = vpop.eup %2021  ;;  %2035 = vpow2.f32 %v1627_v6  ;;  %v636_v14 = vpop.f32.mrf.mxu0 }
 0x136   : > { %2037 = vrcp.f32 %v712_v10  ;;  %v715_v15 = vadd.f32 1.0, %v2022_v13  ;;  %v1628_v16 = vmul.f32 -1.442695, %v2496_v12  ;;  %v2500_v17 = vadd.f32 %v2453_v40, %v636_v14 }
 0x137   : > { %v2024_v18 = vpop.eup %2023  ;;  %2039 = vpow2.f32 %v1625_v11  ;;  %v1838_v19 = vpop.f32.mrf.mxu0 }
 0x138   : > { %2041 = vrcp.f32 %v715_v15  ;;  %v713_v20 = vadd.f32 1.0, %v2024_v18  ;;  %v1626_v21 = vmul.f32 -1.442695, %v2500_v17  ;;  %v2504_v22 = vadd.f32 %v1838_v19, %v2453_v40 }
 0x139   : > { %v2026_v23 = vpop.eup %2025  ;;  %2043 = vpow2.f32 %v1628_v16  ;;  %v649_v24 = vpop.f32.mrf.mxu0 }
 0x13a   : > { %2045 = vrcp.f32 %v713_v20  ;;  %v718_v25 = vadd.f32 1.0, %v2026_v23  ;;  %v1631_v26 = vmul.f32 -1.442695, %v2504_v22  ;;  %v2508_v27 = vadd.f32 %v2453_v40, %v649_v24 }
 0x13b   : > { %v2028_v28 = vpop.eup %2027  ;;  %2047 = vpow2.f32 %v1626_v21  ;;  %v1839_v29 = vpop.f32.mrf.mxu0 }
 0x13c   : > { %2049 = vrcp.f32 %v718_v25  ;;  %v716_v30 = vadd.f32 1.0, %v2028_v28  ;;  %v1629_v31 = vmul.f32 -1.442695, %v2508_v27  ;;  %v2512_v32 = vadd.f32 %v1839_v29, %v2453_v40 }
 0x13d   : > { %v2030_v33 = vpop.eup %2029  ;;  %2051 = vpow2.f32 %v1631_v26  ;;  %v652_v34 = vpop.f32.mrf.mxu0 }
 0x13e   : > { %2053 = vrcp.f32 %v716_v30  ;;  %v719_v35 = vadd.f32 1.0, %v2030_v33  ;;  %v1632_v36 = vmul.f32 -1.442695, %v2512_v32  ;;  %v2516_v37 = vadd.f32 %v2453_v40, %v652_v34 }
 0x13f   : > { %v2032_v38 = vpop.eup %2031  ;;  %2055 = vpow2.f32 %v1629_v31 }
 0x140   : > { %2057 = vrcp.f32 %v719_v35  ;;  %v717_v39 = vadd.f32 1.0, %v2032_v38  ;;  %v1630_v41 = vmul.f32 -1.442695, %v2516_v37 }
 0x141   : > { %v2034_v43 = vpop.eup %2033  ;;  %2059 = vpow2.f32 %v1632_v36 }
 0x142   : > { %v2036_v44 = vpop.eup %2035  ;;  %2061 = vrcp.f32 %v717_v39  ;;  %v762_v0 = vmul.f32 %v2034_v43, %v2456_v42 }
 0x143   : > { %v2038_v46 = vpop.eup %2037  ;;  %2063 = vpow2.f32 %v1630_v41  ;;  %v722_v53 = vadd.f32 1.0, %v2036_v44 }
 0x144   : > { %v2040_v47 = vpop.eup %2039  ;;  %v760_v59 = vmul.f32 %v2038_v46, %v2460_v45 }
 0x145   : > { %v2042_v49 = vpop.eup %2041  ;;  %v720_v50 = vadd.f32 1.0, %v2040_v47 }
 0x146   : > { %v2044_v52 = vpop.eup %2043  ;;  %v763_v40 = vmul.f32 %v2042_v49, %v2464_v48 }
 0x147   : > { %v2046_v55 = vpop.eup %2045  ;;  %v723_v56 = vadd.f32 1.0, %v2044_v52  ;;  %2065 = vrcp.f32 %v720_v50 }
 0x148   : > { %v2048_v58 = vpop.eup %2047  ;;  %v761_v61 = vmul.f32 %v2046_v55, %v2468_v51  ;;  %v777_v6 = vpack.c.bf16 %v763_v40, %v762_v0 }
 0x149   : > { %v2050_v62 = vpop.eup %2049  ;;  %2067 = vrcp.f32 %v723_v56  ;;  %v721_v1 = vadd.f32 1.0, %v2048_v58 }
 0x14a   : > { %v2052_v3 = vpop.eup %2051  ;;  %2069 = vrcp.f32 %v722_v53  ;;  %v776_v4 = vpack.c.bf16 %v761_v61, %v760_v59  ;;  %v766_v16 = vmul.f32 %v2050_v62, %v2472_v54 }
 0x14b   : > { %v2054_v5 = vpop.eup %2053  ;;  %2071 = vrcp.f32 %v721_v1  ;;  %v726_v45 = vadd.f32 1.0, %v2052_v3 }
 0x14c   : > { %v2056_v8 = vpop.eup %2055  ;;  %1856 = vmatprep.mubr.bf16.mxu1 %v776_v4  ;;  %v764_v14 = vmul.f32 %v2054_v5, %v2476_v57 }
 0x14d   : > { %v2058_v48 = vpop.eup %2057  ;;  %v724_v9 = vadd.f32 1.0, %v2056_v8  ;;  %1857 = vmatmul.mubr.bf16.vlgmr.msra.gmra.mxu1 %v777_v6 }
 0x14e   : > { %v2060_v10 = vpop.eup %2059  ;;  %v767_v51 = vmul.f32 %v2058_v48, %v2480_v60 }
 0x14f   : > { %v2062_v11 = vpop.eup %2061  ;;  %v727_v13 = vadd.f32 1.0, %v2060_v10  ;;  %2073 = vrcp.f32 %v724_v9 }
 0x150   : > { %v2064_v42 = vpop.eup %2063  ;;  %v765_v15 = vmul.f32 %v2062_v11, %v2484_v63  ;;  %v779_v20 = vpack.c.bf16 %v767_v51, %v766_v16 }
 0x151   : > { %2075 = vrcp.f32 %v727_v13  ;;  %v725_v18 = vadd.f32 1.0, %v2064_v42 }
 0x152   : > { %2077 = vrcp.f32 %v726_v45  ;;  %v778_v19 = vpack.c.bf16 %v765_v15, %v764_v14 }
 0x153   : > { %2079 = vrcp.f32 %v725_v18 }
 0x154   : > { %1860 = vmatprep.mubr.bf16.mxu1 %v778_v19  ;;  %v2066_v21 = vpop.eup %2065 }
 0x155   : > { %1861 = vmatmul.mubr.bf16.gmra.mxu1 %v779_v20  ;;  %v768_v57 = vmul.f32 %v2066_v21, %v2492_v7 }
 0x156   : > { %v2068_v23 = vpop.eup %2067 }
 0x157   : > { %v2070_v60 = vpop.eup %2069  ;;  %v771_v25 = vmul.f32 %v2068_v23, %v2496_v12 }
 0x158   : > { %v2072_v24 = vpop.eup %2071  ;;  %v770_v54 = vmul.f32 %v2070_v60, %v2488_v2  ;;  %v2538_v2 = vld [vmem:[%s2703_s4] ss:$0 sm:$0xff] }
 0x159   : > { %v769_v63 = vmul.f32 %v2072_v24, %v2500_v17 }
 0x15a   : > { %v781_v28 = vpack.c.bf16 %v771_v25, %v770_v54 }
 0x15b   : > { %v780_v26 = vpack.c.bf16 %v769_v63, %v768_v57 }
 0x15c   : > { %v2074_v29 = vpop.eup %2073 }
 0x15d   : > { %1864 = vmatprep.mubr.bf16.mxu1 %v780_v26  ;;  %v772_v35 = vmul.f32 %v2074_v29, %v2508_v27 }
 0x15e   : > { %v2076_v30 = vpop.eup %2075  ;;  %1865 = vmatmul.mubr.bf16.gmra.mxu1 %v781_v28 }
 0x15f   : > { %v2078_v31 = vpop.eup %2077  ;;  %v775_v34 = vmul.f32 %v2076_v30, %v2512_v32 }
 0x160   : > { %v2080_v33 = vpop.eup %2079  ;;  %v774_v7 = vmul.f32 %v2078_v31, %v2504_v22 }
 0x161   : > { %v773_v12 = vmul.f32 %v2080_v33, %v2516_v37 }
 0x162   : > { %v783_v17 = vpack.c.bf16 %v775_v34, %v774_v7 }
 0x163   : > { %v782_v36 = vpack.c.bf16 %v773_v12, %v772_v35 }
 0x165   : > { %1868 = vmatprep.mubr.bf16.mxu1 %v782_v36 }
 0x166   : > { %1869 = vmatmul.mubr.bf16.gmra.mxu1 %v783_v17 }
 0x20d   : > { %v1858_v38 = vpop.f32.mrf.mxu1 }
 0x20e   : > { %v2541_v39 = vadd.f32 %v1858_v38, %v2538_v2 }
 0x20f   : > { %v889_v32 = vpop.f32.mrf.mxu1 }
 0x210   : > { %v1644_v27 = vmul.f32 -1.442695, %v2541_v39  ;;  %v2545_v37 = vadd.f32 %v2538_v2, %v889_v32 }
 0x211   : > { %v1859_v22 = vpop.f32.mrf.mxu1 }
 0x212   : > { %2081 = vpow2.f32 %v1644_v27  ;;  %v1642_v41 = vmul.f32 -1.442695, %v2545_v37  ;;  %v2549_v43 = vadd.f32 %v1859_v22, %v2538_v2 }
 0x213   : > { %v892_v44 = vpop.f32.mrf.mxu1 }
 0x214   : > { %2083 = vpow2.f32 %v1642_v41  ;;  %v1645_v46 = vmul.f32 -1.442695, %v2549_v43  ;;  %v2553_v47 = vadd.f32 %v2538_v2, %v892_v44 }
 0x215   : > { %v1862_v49 = vpop.f32.mrf.mxu1 }
 0x216   : > { %2085 = vpow2.f32 %v1645_v46  ;;  %v1643_v50 = vmul.f32 -1.442695, %v2553_v47  ;;  %v2557_v52 = vadd.f32 %v1862_v49, %v2538_v2 }
 0x217   : > { %v905_v53 = vpop.f32.mrf.mxu1 }
 0x218   : > { %2087 = vpow2.f32 %v1643_v50  ;;  %v1648_v55 = vmul.f32 -1.442695, %v2557_v52  ;;  %v2561_v40 = vadd.f32 %v2538_v2, %v905_v53 }
 0x219   : > { %v1863_v56 = vpop.f32.mrf.mxu1 }
 0x21a   : > { %2089 = vpow2.f32 %v1648_v55  ;;  %v1646_v58 = vmul.f32 -1.442695, %v2561_v40  ;;  %v2565_v59 = vadd.f32 %v1863_v56, %v2538_v2 }
 0x21b   : > { %v908_v61 = vpop.f32.mrf.mxu1 }
 0x21c   : > { %2091 = vpow2.f32 %v1646_v58  ;;  %v1649_v62 = vmul.f32 -1.442695, %v2565_v59  ;;  %v2569_v0 = vadd.f32 %v2538_v2, %v908_v61 }
 0x21e   : > { %2093 = vpow2.f32 %v1649_v62  ;;  %v1647_v1 = vmul.f32 -1.442695, %v2569_v0  ;;  %v1866_v3 = vpop.f32.mrf.mxu1 }
 0x21f   : > { %v2082_v4 = vpop.eup %2081  ;;  %v2573_v5 = vadd.f32 %v1866_v3, %v2538_v2 }
 0x220   : > { %v1002_v6 = vadd.f32 1.0, %v2082_v4  ;;  %2095 = vpow2.f32 %v1647_v1  ;;  %v921_v8 = vpop.f32.mrf.mxu1 }
 0x221   : > { %v2084_v48 = vpop.eup %2083  ;;  %v1652_v9 = vmul.f32 -1.442695, %v2573_v5  ;;  %v2577_v10 = vadd.f32 %v2538_v2, %v921_v8 }
 0x222   : > { %2097 = vrcp.f32 %v1002_v6  ;;  %v1000_v45 = vadd.f32 1.0, %v2084_v48  ;;  %v1867_v11 = vpop.f32.mrf.mxu1 }
 0x223   : > { %v2086_v51 = vpop.eup %2085  ;;  %2099 = vpow2.f32 %v1652_v9  ;;  %v1650_v13 = vmul.f32 -1.442695, %v2577_v10  ;;  %v2581_v42 = vadd.f32 %v1867_v11, %v2538_v2 }
 0x224   : > { %2101 = vrcp.f32 %v1000_v45  ;;  %v1003_v14 = vadd.f32 1.0, %v2086_v51  ;;  %v924_v15 = vpop.f32.mrf.mxu1 }
 0x225   : > { %v2088_v16 = vpop.eup %2087  ;;  %2103 = vpow2.f32 %v1650_v13  ;;  %v1653_v18 = vmul.f32 -1.442695, %v2581_v42  ;;  %v2585_v19 = vadd.f32 %v2538_v2, %v924_v15 }
 0x226   : > { %2105 = vrcp.f32 %v1003_v14  ;;  %v1001_v20 = vadd.f32 1.0, %v2088_v16  ;;  %v1870_v21 = vpop.f32.mrf.mxu1 }
 0x227   : > { %v2090_v23 = vpop.eup %2089  ;;  %2107 = vpow2.f32 %v1653_v18  ;;  %v1651_v60 = vmul.f32 -1.442695, %v2585_v19  ;;  %v2589_v24 = vadd.f32 %v1870_v21, %v2538_v2 }
 0x228   : > { %2109 = vrcp.f32 %v1001_v20  ;;  %v1006_v25 = vadd.f32 1.0, %v2090_v23  ;;  %v937_v57 = vpop.f32.mrf.mxu1 }
 0x229   : > { %v2092_v63 = vpop.eup %2091  ;;  %2111 = vpow2.f32 %v1651_v60  ;;  %v1656_v54 = vmul.f32 -1.442695, %v2589_v24  ;;  %v2593_v26 = vadd.f32 %v2538_v2, %v937_v57 }
 0x22a   : > { %2113 = vrcp.f32 %v1006_v25  ;;  %v1004_v28 = vadd.f32 1.0, %v2092_v63  ;;  %v1871_v29 = vpop.f32.mrf.mxu1 }
 0x22b   : > { %v2094_v30 = vpop.eup %2093  ;;  %2115 = vpow2.f32 %v1656_v54  ;;  %v1654_v31 = vmul.f32 -1.442695, %v2593_v26  ;;  %v2597_v33 = vadd.f32 %v1871_v29, %v2538_v2 }
 0x22c   : > { %2117 = vrcp.f32 %v1004_v28  ;;  %v1007_v34 = vadd.f32 1.0, %v2094_v30  ;;  %v940_v35 = vpop.f32.mrf.mxu1 }
 0x22d   : > { %v2096_v12 = vpop.eup %2095  ;;  %2119 = vpow2.f32 %v1654_v31  ;;  %v1657_v7 = vmul.f32 -1.442695, %v2597_v33  ;;  %v2601_v36 = vadd.f32 %v2538_v2, %v940_v35 }
 0x22e   : > { %2121 = vrcp.f32 %v1007_v34  ;;  %v1005_v17 = vadd.f32 1.0, %v2096_v12 }
 0x22f   : > { %v2098_v38 = vpop.eup %2097  ;;  %2123 = vpow2.f32 %v1657_v7  ;;  %v1655_v32 = vmul.f32 -1.442695, %v2601_v36 }
 0x230   : > { %v2100_v27 = vpop.eup %2099  ;;  %2125 = vrcp.f32 %v1005_v17  ;;  %v1050_v53 = vmul.f32 %v2098_v38, %v2541_v39 }
 0x231   : > { %v2102_v22 = vpop.eup %2101  ;;  %v1010_v41 = vadd.f32 1.0, %v2100_v27  ;;  %2127 = vpow2.f32 %v1655_v32 }
 0x232   : > { %v2104_v44 = vpop.eup %2103  ;;  %v1048_v61 = vmul.f32 %v2102_v22, %v2545_v37 }
 0x233   : > { %v2106_v46 = vpop.eup %2105  ;;  %v1008_v49 = vadd.f32 1.0, %v2104_v44  ;;  %2129 = vrcp.f32 %v1010_v41 }
 0x234   : > { %v2108_v50 = vpop.eup %2107  ;;  %v1051_v2 = vmul.f32 %v2106_v46, %v2549_v43 }
 0x235   : > { %v2110_v55 = vpop.eup %2109  ;;  %v1011_v56 = vadd.f32 1.0, %v2108_v50  ;;  %2131 = vrcp.f32 %v1008_v49 }
 0x236   : > { %v2112_v58 = vpop.eup %2111  ;;  %v1721_v62 = vpack.c.bf16 %v1051_v2, %v1050_v53  ;;  %v1049_v1 = vmul.f32 %v2110_v55, %v2553_v47 }
 0x237   : > { %v2114_v3 = vpop.eup %2113  ;;  %2133 = vrcp.f32 %v1011_v56  ;;  %v1009_v4 = vadd.f32 1.0, %v2112_v58 }
 0x238   : > { %v2116_v6 = vpop.eup %2115  ;;  %1753 = vst [vmem:[#allocation2 + $0x8] sm:$0xff] %v1721_v62   ;;  %v1716_v8 = vpack.c.bf16 %v1049_v1, %v1048_v61  ;;  %v1054_v37 = vmul.f32 %v2114_v3, %v2557_v52 }
 0x239   : > { %v2118_v48 = vpop.eup %2117  ;;  %2135 = vrcp.f32 %v1009_v4  ;;  %v1014_v39 = vadd.f32 1.0, %v2116_v6 }
 0x23a   : > { %v2120_v43 = vpop.eup %2119  ;;  %1717 = vst [vmem:[#allocation2] sm:$0xff] %v1716_v8   ;;  %v1052_v15 = vmul.f32 %v2118_v48, %v2561_v40 }
 0x23b   : > { %v2122_v9 = vpop.eup %2121  ;;  %v1012_v45 = vadd.f32 1.0, %v2120_v43  ;;  %2137 = vrcp.f32 %v1014_v39 }
 0x23c   : > { %v2124_v11 = vpop.eup %2123  ;;  %v1055_v51 = vmul.f32 %v2122_v9, %v2565_v59 }
 0x23d   : > { %v2126_v47 = vpop.eup %2125  ;;  %v1015_v13 = vadd.f32 1.0, %v2124_v11  ;;  %2139 = vrcp.f32 %v1012_v45 }
 0x23e   : > { %v2128_v14 = vpop.eup %2127  ;;  %v1731_v16 = vpack.c.bf16 %v1055_v51, %v1054_v37  ;;  %v1053_v18 = vmul.f32 %v2126_v47, %v2569_v0 }
 0x23f   : > { %2141 = vrcp.f32 %v1015_v13  ;;  %v1013_v20 = vadd.f32 1.0, %v2128_v14 }
 0x240   : > { %1755 = vst [vmem:[#allocation2 + $0x18] sm:$0xff] %v1731_v16   ;;  %v1726_v21 = vpack.c.bf16 %v1053_v18, %v1052_v15  ;;  %v2130_v23 = vpop.eup %2129 }
 0x241   : > { %2143 = vrcp.f32 %v1013_v20  ;;  %v1058_v59 = vmul.f32 %v2130_v23, %v2573_v5 }
 0x242   : > { %1754 = vst [vmem:[#allocation2 + $0x10] sm:$0xff] %v1726_v21   ;;  %v2132_v52 = vpop.eup %2131 }
 0x243   : > { %v1056_v40 = vmul.f32 %v2132_v52, %v2577_v10 }
 0x244   : > { %v2134_v60 = vpop.eup %2133 }
 0x245   : > { %v1059_v25 = vmul.f32 %v2134_v60, %v2581_v42 }
 0x246   : > { %v2136_v57 = vpop.eup %2135 }
 0x247   : > { %v1741_v63 = vpack.c.bf16 %v1059_v25, %v1058_v59  ;;  %v1057_v0 = vmul.f32 %v2136_v57, %v2585_v19 }
 0x248   : > { %v2138_v28 = vpop.eup %2137 }
 0x249   : > { %1757 = vst [vmem:[#allocation2 + $0x28] sm:$0xff] %v1741_v63   ;;  %v1736_v54 = vpack.c.bf16 %v1057_v0, %v1056_v40  ;;  %v1062_v31 = vmul.f32 %v2138_v28, %v2589_v24 }
 0x24a   : > { %v2140_v29 = vpop.eup %2139 }
 0x24b   : > { %1756 = vst [vmem:[#allocation2 + $0x20] sm:$0xff] %v1736_v54   ;;  %v1060_v5 = vmul.f32 %v2140_v29, %v2593_v26 }
 0x24c   : > { %v2142_v30 = vpop.eup %2141 }
 0x24d   : > { %v1063_v34 = vmul.f32 %v2142_v30, %v2597_v33 }
 0x24e   : > { %v2144_v35 = vpop.eup %2143 }
 0x24f   : > { %v1751_v42 = vpack.c.bf16 %v1063_v34, %v1062_v31  ;;  %v1061_v12 = vmul.f32 %v2144_v35, %v2601_v36 }
 0x251   : > { %1759 = vst [vmem:[#allocation2 + $0x38] sm:$0xff] %v1751_v42   ;;  %v1746_v10 = vpack.c.bf16 %v1061_v12, %v1060_v5 }
 0x253   : > { %1758 = vst [vmem:[#allocation2 + $0x30] sm:$0xff] %v1746_v10  }
 0x254 PF: > { %v2145_v19 = vld [vmem:[%s2389_s24 + $0x38] sm:$0xff]   ;;  %v2146_v7 = vld [vmem:[%s2389_s24 + $0x30] sm:$0xff]   ;;  %v2147_v24 = vld [vmem:[%s2389_s24 + $0x28] sm:$0xff]   ;;  %s1920_s22 = smul.u32 (%p2340_p9), 48, %s2219_s29 }
 0x255   : > { %1872 = vmatprep.subr.bf16.mxu0 %v2145_v19  ;;  %1904 = vmatprep.subr.bf16.mxu1 %v2145_v19  ;;  %v2148_v26 = vld [vmem:[%s2389_s24 + $0x20] sm:$0xff]   ;;  %v2149_v17 = vld [vmem:[%s2389_s24 + $0x18] sm:$0xff]   ;;  %v2150_v38 = vld [vmem:[%s2389_s24 + $0x10] sm:$0xff]  }
 0x256   : > { %1873 = vmatpush3.bf16.msra.mxu0 %v2145_v19  ;;  %1912 = vmatpush3.bf16.msra.mxu1 %v2145_v19  ;;  %v2153_v33 = vld [vmem:[#allocation2] sm:$0xff]   ;;  %v2151_v32 = vld [vmem:[%s2389_s24 + $0x8] sm:$0xff]   ;;  %v2157_v44 = vld [vmem:[#allocation2 + $0x10] sm:$0xff]   ;;  %s1401_s19 = sadd.s32 (%p2340_p9), %s2215_s28, %s1920_s22 }
 0x257   : > { %1874 = vmatprep.subr.bf16.mxu0 %v2146_v7  ;;  %1905 = vmatprep.subr.bf16.mxu1 %v2146_v7  ;;  %v2154_v36 = vld [vmem:[#allocation2 + $0x20] sm:$0xff]   ;;  %v2155_v22 = vld [vmem:[#allocation2 + $0x8] sm:$0xff]   ;;  %v2159_v49 = vld [vmem:[#allocation2 + $0x18] sm:$0xff]  }
 0x258   : > { %1888 = vmatprep.mubr.bf16.mxu0 %v2153_v33  ;;  %1896 = vmatprep.mubr.bf16.mxu1 %v2154_v36  ;;  %v2152_v27 = vld [vmem:[%s2389_s24] sm:$0xff]   ;;  %v2156_v41 = vld [vmem:[#allocation2 + $0x28] sm:$0xff]   ;;  %v2160_v50 = vld [vmem:[#allocation2 + $0x38] sm:$0xff]  }
 0x259   : > { %v1674_v53 = vld [vmem:[%s425_s10] ss:$0 sm:$0xff]  ;;  %s1694_s10 = sshll.u32 (%p2340_p9), %s1401_s19, 3 }
 0x25a   : > { %1875 = vmatpush3.bf16.msra.mxu0 %v2146_v7  ;;  %1913 = vmatpush3.bf16.msra.mxu1 %v2146_v7  ;;  %v2158_v46 = vld [vmem:[#allocation2 + $0x30] sm:$0xff]   ;;  %s1403_s29 = scalar_lea.vmem (%p2340_p9), %s2706_s7, %s1694_s10 }
 0x25b   : > { %1876 = vmatprep.subr.bf16.mxu0 %v2147_v24  ;;  %1906 = vmatprep.subr.bf16.mxu1 %v2147_v24 }
 0x25e   : > { %1877 = vmatpush3.bf16.msra.mxu0 %v2147_v24  ;;  %1914 = vmatpush3.bf16.msra.mxu1 %v2147_v24 }
 0x25f   : > { %1878 = vmatprep.subr.bf16.mxu0 %v2148_v26  ;;  %1907 = vmatprep.subr.bf16.mxu1 %v2148_v26 }
 0x262   : > { %1879 = vmatpush3.bf16.msra.mxu0 %v2148_v26  ;;  %1915 = vmatpush3.bf16.msra.mxu1 %v2148_v26 }
 0x263   : > { %1880 = vmatprep.subr.bf16.mxu0 %v2149_v17  ;;  %1908 = vmatprep.subr.bf16.mxu1 %v2149_v17 }
 0x266   : > { %1881 = vmatpush3.bf16.msra.mxu0 %v2149_v17  ;;  %1916 = vmatpush3.bf16.msra.mxu1 %v2149_v17 }
 0x267   : > { %1882 = vmatprep.subr.bf16.mxu0 %v2150_v38  ;;  %1909 = vmatprep.subr.bf16.mxu1 %v2150_v38 }
 0x26a   : > { %1883 = vmatpush3.bf16.msra.mxu0 %v2150_v38  ;;  %1917 = vmatpush3.bf16.msra.mxu1 %v2150_v38 }
 0x26b   : > { %1884 = vmatprep.subr.bf16.mxu0 %v2151_v32  ;;  %1910 = vmatprep.subr.bf16.mxu1 %v2151_v32 }
 0x26e   : > { %1885 = vmatpush3.bf16.msra.mxu0 %v2151_v32  ;;  %1918 = vmatpush3.bf16.msra.mxu1 %v2151_v32 }
 0x26f   : > { %1886 = vmatprep.subr.bf16.mxu0 %v2152_v27  ;;  %1911 = vmatprep.subr.bf16.mxu1 %v2152_v27 }
 0x272   : > { %1887 = vmatpush3.bf16.msra.mxu0 %v2152_v27  ;;  %1919 = vmatpush3.bf16.msra.mxu1 %v2152_v27 }
 0x275   : > { %1889 = vmatmul.mubr.bf16.vlgmr.msra.gmra.mxu0 %v2155_v22  ;;  %1897 = vmatmul.mubr.bf16.vlgmr.msra.gmra.mxu1 %v2156_v41 }
 0x276   : > { %1892 = vmatprep.mubr.bf16.mxu0 %v2157_v44  ;;  %1900 = vmatprep.mubr.bf16.mxu1 %v2158_v46 }
 0x27d   : > { %1893 = vmatmul.mubr.bf16.gmra.mxu0 %v2159_v49  ;;  %1901 = vmatmul.mubr.bf16.gmra.mxu1 %v2160_v50 }
 0x335   : > { %v1890_v2 = vpop.f32.mrf.mxu0  ;;  %v1898_v55 = vpop.f32.mrf.mxu1 }
 0x336   : > { %v1322_v56 = vadd.f32 %v1890_v2, %v1674_v53  ;;  %v1354_v58 = vadd.f32 %v1898_v55, %v1674_v53 }
 0x337   : > { %v1313_v61 = vpop.f32.mrf.mxu0  ;;  %v1345_v62 = vpop.f32.mrf.mxu1 }
 0x338   : > { %1378 = vst [vmem:[%s2391_s26 + $0x10] sm:$0xff] %v1322_v56  ;;  %1386 = vst [vmem:[%s2391_s26 + $0x50] sm:$0xff] %v1354_v58  ;;  %v1314_v1 = vadd.f32 %v1674_v53, %v1313_v61  ;;  %v1346_v3 = vadd.f32 %v1674_v53, %v1345_v62 }
 0x339   : > { %v1891_v4 = vpop.f32.mrf.mxu0  ;;  %v1899_v6 = vpop.f32.mrf.mxu1 }
 0x33a   : > { %1376 = vst [vmem:[%s2391_s26] sm:$0xff] %v1314_v1  ;;  %1384 = vst [vmem:[%s2391_s26 + $0x40] sm:$0xff] %v1346_v3  ;;  %v1325_v8 = vadd.f32 %v1891_v4, %v1674_v53  ;;  %v1357_v48 = vadd.f32 %v1899_v6, %v1674_v53 }
 0x33b   : > { %v1316_v39 = vpop.f32.mrf.mxu0  ;;  %v1348_v43 = vpop.f32.mrf.mxu1 }
 0x33c   : > { %1379 = vst [vmem:[%s2391_s26 + $0x18] sm:$0xff] %v1325_v8  ;;  %1387 = vst [vmem:[%s2391_s26 + $0x58] sm:$0xff] %v1357_v48  ;;  %v1317_v9 = vadd.f32 %v1674_v53, %v1316_v39  ;;  %v1349_v45 = vadd.f32 %v1674_v53, %v1348_v43 }
 0x33d   : > { %v1894_v11 = vpop.f32.mrf.mxu0  ;;  %v1902_v37 = vpop.f32.mrf.mxu1 }
 0x33e   : > { %1377 = vst [vmem:[%s2391_s26 + $0x8] sm:$0xff] %v1317_v9  ;;  %1385 = vst [vmem:[%s2391_s26 + $0x48] sm:$0xff] %v1349_v45  ;;  %v1338_v51 = vadd.f32 %v1894_v11, %v1674_v53  ;;  %v1370_v47 = vadd.f32 %v1902_v37, %v1674_v53 }
 0x33f   : > { %v1329_v13 = vpop.f32.mrf.mxu0  ;;  %v1361_v14 = vpop.f32.mrf.mxu1  ;;  %v1466_v63 = vld [vmem:[%s2391_s26 + $0x10] sm:$0xff] (%p2340_p9) }
 0x340   : > { %1382 = vst [vmem:[%s2391_s26 + $0x30] sm:$0xff] %v1338_v51  ;;  %1390 = vst [vmem:[%s2391_s26 + $0x70] sm:$0xff] %v1370_v47  ;;  %v1330_v15 = vadd.f32 %v1674_v53, %v1329_v13  ;;  %v1362_v16 = vadd.f32 %v1674_v53, %v1361_v14  ;;  %v1482_v35 = vld [vmem:[%s2391_s26 + $0x50] sm:$0xff] (%p2340_p9) }
 0x341   : > { %v1895_v18 = vpop.f32.mrf.mxu0  ;;  %v1903_v20 = vpop.f32.mrf.mxu1  ;;  %v1462_v57 = vld [vmem:[%s2391_s26] sm:$0xff] (%p2340_p9)  ;;  %1467 = vst [vmem:[%s1403_s29 + $0x30] sm:$0xff] (%p2340_p9), %v1466_v63  ;;  %1483 = vst [vmem:[%s1403_s29 + $0xf0] sm:$0xff] (%p2340_p9), %v1482_v35 }
 0x342   : > { %1380 = vst [vmem:[%s2391_s26 + $0x20] sm:$0xff] %v1330_v15  ;;  %1388 = vst [vmem:[%s2391_s26 + $0x60] sm:$0xff] %v1362_v16  ;;  %v1341_v21 = vadd.f32 %v1895_v18, %v1674_v53  ;;  %v1373_v23 = vadd.f32 %v1903_v20, %v1674_v53  ;;  %1398 = sbr.rel (!%p2340_p9) target bundleno = 848 (0x350), region = 97  ;;  %v1478_v31 = vld [vmem:[%s2391_s26 + $0x40] sm:$0xff] (%p2340_p9) }
 0x343   : > { %v1332_v52 = vpop.f32.mrf.mxu0  ;;  %v1364_v60 = vpop.f32.mrf.mxu1  ;;  %v1468_v0 = vld [vmem:[%s2391_s26 + $0x18] sm:$0xff] (%p2340_p9)  ;;  %1463 = vst [vmem:[%s1403_s29] sm:$0xff] (%p2340_p9), %v1462_v57  ;;  %1479 = vst [vmem:[%s1403_s29 + $0xc0] sm:$0xff] (%p2340_p9), %v1478_v31 }
 0x344   : > { %1383 = vst [vmem:[%s2391_s26 + $0x38] sm:$0xff] %v1341_v21  ;;  %1391 = vst [vmem:[%s2391_s26 + $0x78] sm:$0xff] %v1373_v23  ;;  %v1333_v59 = vadd.f32 %v1674_v53, %v1332_v52  ;;  %v1365_v25 = vadd.f32 %v1674_v53, %v1364_v60  ;;  %v1484_v5 = vld [vmem:[%s2391_s26 + $0x58] sm:$0xff] (%p2340_p9) }
 0x345   : > { %v1464_v40 = vld [vmem:[%s2391_s26 + $0x8] sm:$0xff] (%p2340_p9)  ;;  %1469 = vst [vmem:[%s1403_s29 + $0x48] sm:$0xff] (%p2340_p9), %v1468_v0  ;;  %1485 = vst [vmem:[%s1403_s29 + $0x108] sm:$0xff] (%p2340_p9), %v1484_v5 }
 0x346   : > { %1381 = vst [vmem:[%s2391_s26 + $0x28] sm:$0xff] %v1333_v59  ;;  %1389 = vst [vmem:[%s2391_s26 + $0x68] sm:$0xff] %v1365_v25  ;;  %v1480_v34 = vld [vmem:[%s2391_s26 + $0x48] sm:$0xff] (%p2340_p9) }
 0x347   : > { %v1474_v29 = vld [vmem:[%s2391_s26 + $0x30] sm:$0xff]  ;;  %1465 = vst [vmem:[%s1403_s29 + $0x18] sm:$0xff] %v1464_v40  ;;  %1481 = vst [vmem:[%s1403_s29 + $0xd8] sm:$0xff] %v1480_v34 }
 0x348   : > { %v1490_v10 = vld [vmem:[%s2391_s26 + $0x70] sm:$0xff]  ;;  %1475 = vst [vmem:[%s1403_s29 + $0x90] sm:$0xff] %v1474_v29 }
 0x349   : > { %v1470_v54 = vld [vmem:[%s2391_s26 + $0x20] sm:$0xff]  ;;  %1491 = vst [vmem:[%s1403_s29 + $0x150] sm:$0xff] %v1490_v10 }
 0x34a   : > { %v1486_v42 = vld [vmem:[%s2391_s26 + $0x60] sm:$0xff]  ;;  %1471 = vst [vmem:[%s1403_s29 + $0x60] sm:$0xff] %v1470_v54 }
 0x34b   : > { %v1476_v30 = vld [vmem:[%s2391_s26 + $0x38] sm:$0xff]  ;;  %1487 = vst [vmem:[%s1403_s29 + $0x120] sm:$0xff] %v1486_v42 }
 0x34c   : > { %1477 = vst [vmem:[%s1403_s29 + $0xa8] sm:$0xff] %v1476_v30  ;;  %v1492_v19 = vld [vmem:[%s2391_s26 + $0x78] sm:$0xff] }
 0x34d   : > { %v1472_v28 = vld [vmem:[%s2391_s26 + $0x28] sm:$0xff]  ;;  %1493 = vst [vmem:[%s1403_s29 + $0x168] sm:$0xff] %v1492_v19 }
 0x34e   : > { %v1488_v12 = vld [vmem:[%s2391_s26 + $0x68] sm:$0xff]  ;;  %1473 = vst [vmem:[%s1403_s29 + $0x78] sm:$0xff] %v1472_v28 }
 0x34f   : > { %1489 = vst [vmem:[%s1403_s29 + $0x138] sm:$0xff] %v1488_v12 }
 0x350 PF: > { %s17_s9 = sadd.s32 1, %s2231_s9   ;;  %s2716_s29 = sld [smem:[#allocation5_spill]] }
 0x351   : > { %p14_p3 = scmp.ge.s32.totalorder %s17_s9, 11   ;;  %s2717_s18 = sld [smem:[#allocation6_spill]] }
 0x352   : > { %s2718_s8 = sld [smem:[#allocation7_spill]]  ;;  %s2719_s24 = smov %s2203_s25 }
 0x353   : > { %s2720_s25 = smov %s2345_s20  ;;  %s2721_s26 = smov %s2211_s27 }
 0x354   : > { %s2722_s27 = smov %s2334_s16  ;;  %s2723_s28 = smov %s2223_s30 }
 0x355   :  { %16 = sbr.rel (!%p14_p3) target bundleno = 7 (0x7), region = 172 }
 0x357   : > { %s2724_s30 = smov %s2717_s18 }

</bundles_post_ra>
